<compile_context>
chip_gen: v5e
topology: v5e:2x2
jax: 0.10.0
libtpu: 0.0.40
codegen_flags: <defaults>
</compile_context>

<pallas_src>
import jax
import jax.numpy as jnp
from jax.experimental import pallas as pl
from jax.experimental.pallas import tpu as pltpu

B, S, H, L = 2, 16, 128, 8
VOCAB = 64

_NEG_BIG = 1e30   # finite masking value (avoids -inf -> NaN paths)


def relation_head_kernel(b1_ref,      # [TB, S]   f32 additive mask bias, entity 1
                         b2_ref,      # [TB, S]   f32 additive mask bias, entity 2
                         hs_ref,      # [TB, S, H] compute dtype (bf16)
                         wt_ref,      # [H, 2]    pooling vectors (w_e1 | w_e2)
                         cw_ref,      # [2H, Lp]  classifier weight, lane-padded
                         cb_ref,      # [1, Lp]   classifier bias, lane-padded
                         out_ref):    # [TB, Lp]  f32, lane-dense
    hs = hs_ref[...]                                            # [TB, S, H]
    tb, s_len, h = hs.shape

    # ---- both entities' attention scores in ONE MXU pass over hs ---------
    hs2d = hs.reshape(tb * s_len, h)                            # [TB*S, H]
    scores = jnp.dot(hs2d, wt_ref[...],
                     preferred_element_type=jnp.float32)        # [TB*S, 2]
    scores = scores.reshape(tb, s_len, 2)                       # [TB, S, 2]

    def masked_softmax(sc, bias):                               # [TB, S] -> [TB, S]
        sc = sc + bias                                          # masked -> -1e30
        m = jnp.max(sc, axis=-1, keepdims=True)                 # [TB, 1]
        ex = jnp.exp(sc - m)                                    # masked -> 0
        denom = jnp.sum(ex, axis=-1, keepdims=True)             # [TB, 1]
        return ex * pl.reciprocal(denom, approx=False)          # exact, EUP

    a1 = masked_softmax(scores[:, :, 0], b1_ref[...])           # [TB, S]
    a2 = masked_softmax(scores[:, :, 1], b2_ref[...])           # [TB, S]

    # ---- both weighted sums as one batched MXU matmul (hs read once) -----
    attn = jnp.stack([a1, a2], axis=1).astype(hs.dtype)         # [TB, 2, S]
    pooled = jnp.einsum('bes,bsh->beh', attn, hs,
                        preferred_element_type=jnp.float32)     # [TB, 2, H] f32

    # ---- classifier: lane-concat p1||p2 -> single K=2H matmul ------------
    p_cat = pooled.reshape(tb, 2 * h)                           # [TB, 2H] == [p1 | p2]
    logits = (jnp.dot(p_cat, cw_ref[...],
                      preferred_element_type=jnp.float32)
              + cb_ref[...])                                    # [TB, Lp]

    out_ref[...] = logits.astype(out_ref.dtype)                 # dense 128-lane store


def _span_bias(start, end, seq_len):
    """Additive span mask [B, S]: 0 inside span, -1e30 outside.

    end < start falls back to position 0 only (== hs[0], matching PyTorch).
    Out-of-range indices are clamped into [0, seq_len-1] (defensive; PyTorch
    slicing on an empty span would NaN instead).
    """
    pos = jnp.arange(seq_len, dtype=jnp.int32)[None, :]          # [1, S]
    s = start.astype(jnp.int32)[:, None]                         # [B, 1]
    e = end.astype(jnp.int32)[:, None]                           # [B, 1]
    valid = e >= s
    s_eff = jnp.clip(jnp.where(valid, s, 0), 0, seq_len - 1)
    e_eff = jnp.clip(jnp.where(valid, e, 0), 0, seq_len - 1)
    inside = (pos >= s_eff) & (pos <= e_eff)                     # [B, S]
    return jnp.where(inside, 0.0, -_NEG_BIG).astype(jnp.float32)


def relation_classifier_head(hidden_states, e1_start, e1_end, e2_start, e2_end,
                             w_e1, w_e2, cls_w, cls_b, *,
                             batch_tile=None,
                             compute_dtype=jnp.bfloat16,
                             vmem_limit_bytes=32 * 1024 * 1024):
    b, s, h = hidden_states.shape
    l = cls_b.shape[-1]
    lp = ((l + 127) // 128) * 128                 # lane-dense padded label dim

    # Batch tile: whole batch for tiny b; otherwise split so the grid has >=2
    # programs (v7x: one per TensorCore) while staying sublane-aligned (x8).
    if batch_tile is None:
        tb = b // 2 if (b % 16 == 0) else b
    else:
        tb = batch_tile
    assert b % tb == 0, "batch_tile must divide batch"

    # bf16 activations (HBM-bound head); params padded lane-dense in f32.
    hs_c = hidden_states.astype(compute_dtype)                        # [B, S, H]
    w_t = jnp.stack([w_e1, w_e2], axis=-1).astype(compute_dtype)      # [H, 2]
    cw_pad = jnp.zeros((2 * h, lp), jnp.float32).at[:, :l].set(
        cls_w.astype(jnp.float32))                                    # [2H, Lp]
    cb_pad = jnp.zeros((1, lp), jnp.float32).at[0, :l].set(
        cls_b.astype(jnp.float32))                                    # [1, Lp]

    bias1 = _span_bias(e1_start, e1_end, s)                           # [B, S]
    bias2 = _span_bias(e2_start, e2_end, s)                           # [B, S]

    grid_spec = pltpu.PrefetchScalarGridSpec(
        num_scalar_prefetch=0,
        grid=(b // tb,),
        in_specs=[
            pl.BlockSpec((tb, s), lambda i: (i, 0)),          # bias e1
            pl.BlockSpec((tb, s), lambda i: (i, 0)),          # bias e2
            # NOTE: pipeline_mode=pl.Buffered(3) is worth sweeping here for
            # large DMA-exposed tiles; default double-buffering kept for
            # maximum compatibility.
            pl.BlockSpec((tb, s, h), lambda i: (i, 0, 0)),    # hidden states tile
            pl.BlockSpec((h, 2), lambda i: (0, 0)),           # pooling vectors
            pl.BlockSpec((2 * h, lp), lambda i: (0, 0)),      # classifier W (padded)
            pl.BlockSpec((1, lp), lambda i: (0, 0)),          # classifier b (padded)
        ],
        out_specs=pl.BlockSpec((tb, lp), lambda i: (i, 0)),
    )

    itemsize = jnp.dtype(compute_dtype).itemsize
    cost = pl.CostEstimate(
        flops=int(8 * b * s * h + 4 * b * h * lp),
        transcendentals=int(2 * b * s),
        bytes_accessed=int(b * s * h * itemsize + b * lp * 4
                           + (2 * h * lp + lp + 2 * h) * 4 + 2 * b * s * 4),
    )

    out = pl.pallas_call(
        relation_head_kernel,
        out_shape=jax.ShapeDtypeStruct((b, lp), jnp.float32),
        grid_spec=grid_spec,
        compiler_params=pltpu.CompilerParams(
            dimension_semantics=("parallel",),        # v7x: batch tiles across TCs
            vmem_limit_bytes=vmem_limit_bytes,        # raise v5e's 16 MiB default
        ),
        cost_estimate=cost,
    )(bias1, bias2, hs_c, w_t, cw_pad, cb_pad)

    return out[:, :l]                                 # drop lane padding


def reference_head(hidden_states, e1s, e1e, e2s, e2e, w1, w2, cls_w, cls_b):
    """Pure-JAX replication of the PyTorch forward (span + attention pooling)."""
    def pool(hs, w, s, e):
        if e >= s:
            span = hs[s:e + 1]
            scores = span @ w
            aw = jax.nn.softmax(scores, axis=0)
            return jnp.sum(aw[:, None] * span, axis=0)
        return hs[0]

    outs = []
    for i in range(hidden_states.shape[0]):
        p1 = pool(hidden_states[i], w1, int(e1s[i]), int(e1e[i]))
        p2 = pool(hidden_states[i], w2, int(e2s[i]), int(e2e[i]))
        concat = jnp.concatenate([p1, p2], axis=-1)
        outs.append(concat @ cls_w + cls_b)
    return jnp.stack(outs, axis=0)


if __name__ == "__main__":
    key = jax.random.PRNGKey(0)
    k_emb, k_ids, k_w1, k_w2, k_cw, k_cb = jax.random.split(key, 6)

    # "Encoder": deterministic embedding lookup standing in for AutoModel.
    embedding = jax.random.normal(k_emb, (VOCAB, H), dtype=jnp.float32)
    input_ids = jax.random.randint(k_ids, (B, S), 0, VOCAB)
    attention_mask = jnp.ones((B, S), dtype=jnp.int32)   # consumed only by encoder
    hidden_states = embedding[input_ids]                  # [B, S, H]

    # Span indices (batch 1 / e2 exercises the end < start fallback -> hs[0]).
    e1_start = jnp.array([2, 1], dtype=jnp.int32)
    e1_end = jnp.array([5, 4], dtype=jnp.int32)
    e2_start = jnp.array([8, 10], dtype=jnp.int32)
    e2_end = jnp.array([11, 3], dtype=jnp.int32)

    # Parameters (AttentionPooling.w ~ randn(H); classifier Linear(2H -> L)).
    w_e1 = jax.random.normal(k_w1, (H,), dtype=jnp.float32)
    w_e2 = jax.random.normal(k_w2, (H,), dtype=jnp.float32)
    cls_w = jax.random.normal(k_cw, (2 * H, L), dtype=jnp.float32) * 0.02
    cls_b = jax.random.normal(k_cb, (L,), dtype=jnp.float32) * 0.02

    logits = relation_classifier_head(hidden_states, e1_start, e1_end,
                                      e2_start, e2_end, w_e1, w_e2, cls_w, cls_b)
    jax.block_until_ready(logits)

    # Reference on the same bf16-quantized activations / pooling vectors the
    # kernel consumes (computed in f32); remaining delta comes from bf16
    # attention weights feeding the MXU weighted sum.
    hs_q = hidden_states.astype(jnp.bfloat16).astype(jnp.float32)
    w1_q = w_e1.astype(jnp.bfloat16).astype(jnp.float32)
    w2_q = w_e2.astype(jnp.bfloat16).astype(jnp.float32)
    ref = reference_head(hs_q, e1_start, e1_end, e2_start, e2_end,
                         w1_q, w2_q, cls_w, cls_b)

    assert logits.shape == (B, L)
    assert jnp.allclose(logits, ref, atol=5e-2, rtol=5e-2), (logits, ref)

    print("KERNEL_OK")
</pallas_src>

<mosaic_0001>
module attributes {stable_mosaic.version = 11 : i64} {
  func.func @relation_head_kernel(%arg0: i32, %arg1: memref<2x16xf32, #tpu.memory_space<vmem>>, %arg2: memref<2x16xf32, #tpu.memory_space<vmem>>, %arg3: memref<2x16x128xbf16, #tpu.memory_space<vmem>>, %arg4: memref<128x2xbf16, #tpu.memory_space<vmem>>, %arg5: memref<256x128xf32, #tpu.memory_space<vmem>>, %arg6: memref<1x128xf32, #tpu.memory_space<vmem>>, %arg7: memref<2x128xf32, #tpu.memory_space<vmem>>) attributes {dimension_semantics = [#tpu.dimension_semantics<parallel>], iteration_bounds = array<i64: 1>, scalar_prefetch = 0 : i64, scratch_operands = 0 : i64, tpu.core_type = #tpu.core_type<tc>, window_params = [{transform_indices = @transform_0, window_bounds = array<i64: 2, 16>}, {transform_indices = @transform_1, window_bounds = array<i64: 2, 16>}, {transform_indices = @transform_2, window_bounds = array<i64: 2, 16, 128>}, {pipeline_mode = #tpu.pipeline_mode<synchronous>, transform_indices = @transform_3, window_bounds = array<i64: 128, 2>}, {pipeline_mode = #tpu.pipeline_mode<synchronous>, transform_indices = @transform_4, window_bounds = array<i64: 256, 128>}, {pipeline_mode = #tpu.pipeline_mode<synchronous>, transform_indices = @transform_5, window_bounds = array<i64: 1, 128>}, {transform_indices = @transform_6, window_bounds = array<i64: 2, 128>}]} {
    %c0 = arith.constant 0 : index
    %c0_0 = arith.constant 0 : index
    %c0_1 = arith.constant 0 : index
    %0 = vector.load %arg3[%c0, %c0_0, %c0_1] : memref<2x16x128xbf16, #tpu.memory_space<vmem>>, vector<2x16x128xbf16>
    %1 = vector.shape_cast %0 : vector<2x16x128xbf16> to vector<32x128xbf16>
    %c0_2 = arith.constant 0 : index
    %c0_3 = arith.constant 0 : index
    %2 = vector.load %arg4[%c0_2, %c0_3] : memref<128x2xbf16, #tpu.memory_space<vmem>>, vector<128x2xbf16>
    %cst = arith.constant dense<0.000000e+00> : vector<32x2xf32>
    %3 = tpu.matmul %1, %2, %cst {dimension_numbers = #tpu.dot_dimension_numbers<[1], [0], [0], [1], [0, 0, 1, 1], [], []>} : vector<32x128xbf16>, vector<128x2xbf16>, vector<32x2xf32> -> vector<32x2xf32>
    %4 = vector.shape_cast %3 : vector<32x2xf32> to vector<2x16x2xf32>
    %5 = vector.extract_strided_slice %4 {offsets = [0, 0, 0], sizes = [2, 16, 1], strides = [1, 1, 1]} : vector<2x16x2xf32> to vector<2x16x1xf32>
    %6 = vector.shape_cast %5 : vector<2x16x1xf32> to vector<2x16xf32>
    %c0_4 = arith.constant 0 : index
    %c0_5 = arith.constant 0 : index
    %7 = vector.load %arg1[%c0_4, %c0_5] : memref<2x16xf32, #tpu.memory_space<vmem>>, vector<2x16xf32>
    %8 = arith.addf %6, %7 : vector<2x16xf32>
    %cst_6 = arith.constant dense<0xFF800000> : vector<2xf32>
    %9 = vector.multi_reduction <maximumf>, %8, %cst_6 [1] : vector<2x16xf32> to vector<2xf32>
    %10 = vector.shape_cast %9 : vector<2xf32> to vector<2x1xf32>
    %11 = vector.broadcast %10 : vector<2x1xf32> to vector<2x16xf32>
    %12 = arith.subf %8, %11 : vector<2x16xf32>
    %13 = math.exp %12 : vector<2x16xf32>
    %cst_7 = arith.constant dense<0.000000e+00> : vector<2xf32>
    %14 = vector.multi_reduction <add>, %13, %cst_7 [1] : vector<2x16xf32> to vector<2xf32>
    %15 = vector.shape_cast %14 : vector<2xf32> to vector<2x1xf32>
    %16 = tpu.reciprocal %15 : vector<2x1xf32> -> vector<2x1xf32>
    %17 = vector.broadcast %16 : vector<2x1xf32> to vector<2x16xf32>
    %18 = arith.mulf %13, %17 : vector<2x16xf32>
    %19 = vector.extract_strided_slice %4 {offsets = [0, 0, 1], sizes = [2, 16, 1], strides = [1, 1, 1]} : vector<2x16x2xf32> to vector<2x16x1xf32>
    %20 = vector.shape_cast %19 : vector<2x16x1xf32> to vector<2x16xf32>
    %c0_8 = arith.constant 0 : index
    %c0_9 = arith.constant 0 : index
    %21 = vector.load %arg2[%c0_8, %c0_9] : memref<2x16xf32, #tpu.memory_space<vmem>>, vector<2x16xf32>
    %22 = arith.addf %20, %21 : vector<2x16xf32>
    %cst_10 = arith.constant dense<0xFF800000> : vector<2xf32>
    %23 = vector.multi_reduction <maximumf>, %22, %cst_10 [1] : vector<2x16xf32> to vector<2xf32>
    %24 = vector.shape_cast %23 : vector<2xf32> to vector<2x1xf32>
    %25 = vector.broadcast %24 : vector<2x1xf32> to vector<2x16xf32>
    %26 = arith.subf %22, %25 : vector<2x16xf32>
    %27 = math.exp %26 : vector<2x16xf32>
    %cst_11 = arith.constant dense<0.000000e+00> : vector<2xf32>
    %28 = vector.multi_reduction <add>, %27, %cst_11 [1] : vector<2x16xf32> to vector<2xf32>
    %29 = vector.shape_cast %28 : vector<2xf32> to vector<2x1xf32>
    %30 = tpu.reciprocal %29 : vector<2x1xf32> -> vector<2x1xf32>
    %31 = vector.broadcast %30 : vector<2x1xf32> to vector<2x16xf32>
    %32 = arith.mulf %27, %31 : vector<2x16xf32>
    %33 = vector.shape_cast %18 : vector<2x16xf32> to vector<2x1x16xf32>
    %34 = vector.shape_cast %32 : vector<2x16xf32> to vector<2x1x16xf32>
    %35 = tpu.concatenate %33, %34 in 1 : vector<2x1x16xf32>, vector<2x1x16xf32> -> vector<2x2x16xf32>
    %36 = arith.truncf %35 : vector<2x2x16xf32> to vector<2x2x16xbf16>
    "tpu.trace_start"() <{level = 10 : i32, message = "bes,bsh->beh"}> : () -> ()
    %cst_12 = arith.constant dense<0.000000e+00> : vector<2x2x128xf32>
    %37 = tpu.matmul %36, %0, %cst_12 {dimension_numbers = #tpu.dot_dimension_numbers<[2], [1], [1], [2], [0, 0, 0, 1, 1, 2], [0], [0]>} : vector<2x2x16xbf16>, vector<2x16x128xbf16>, vector<2x2x128xf32> -> vector<2x2x128xf32>
    "tpu.trace_stop"() : () -> ()
    %38 = vector.shape_cast %37 : vector<2x2x128xf32> to vector<2x256xf32>
    %c0_13 = arith.constant 0 : index
    %c0_14 = arith.constant 0 : index
    %39 = vector.load %arg5[%c0_13, %c0_14] : memref<256x128xf32, #tpu.memory_space<vmem>>, vector<256x128xf32>
    %cst_15 = arith.constant dense<0.000000e+00> : vector<2x128xf32>
    %40 = tpu.matmul %38, %39, %cst_15 {dimension_numbers = #tpu.dot_dimension_numbers<[1], [0], [0], [1], [0, 0, 1, 1], [], []>} : vector<2x256xf32>, vector<256x128xf32>, vector<2x128xf32> -> vector<2x128xf32>
    %c0_16 = arith.constant 0 : index
    %c0_17 = arith.constant 0 : index
    %41 = vector.load %arg6[%c0_16, %c0_17] : memref<1x128xf32, #tpu.memory_space<vmem>>, vector<1x128xf32>
    %42 = vector.broadcast %41 : vector<1x128xf32> to vector<2x128xf32>
    %43 = arith.addf %40, %42 : vector<2x128xf32>
    %c0_18 = arith.constant 0 : index
    %c0_19 = arith.constant 0 : index
    %44 = vector.load %arg7[%c0_18, %c0_19] : memref<2x128xf32, #tpu.memory_space<vmem>>, vector<2x128xf32>
    tpu.vector_store %arg7[%c0_18, %c0_19], %43 {strides = array<i32>} : memref<2x128xf32, #tpu.memory_space<vmem>>, vector<2x128xf32>,
    return
  }
  func.func @transform_0(%arg0: i32) -> (i32, i32) {
    %c0_i32 = arith.constant 0 : i32
    %c0_i32_0 = arith.constant 0 : i32
    return %arg0, %c0_i32 : i32, i32
  }
  func.func @transform_1(%arg0: i32) -> (i32, i32) {
    %c0_i32 = arith.constant 0 : i32
    %c0_i32_0 = arith.constant 0 : i32
    return %arg0, %c0_i32 : i32, i32
  }
  func.func @transform_2(%arg0: i32) -> (i32, i32, i32) {
    %c0_i32 = arith.constant 0 : i32
    %c0_i32_0 = arith.constant 0 : i32
    %c0_i32_1 = arith.constant 0 : i32
    return %arg0, %c0_i32, %c0_i32_0 : i32, i32, i32
  }
  func.func @transform_3(%arg0: i32) -> (i32, i32) {
    %c0_i32 = arith.constant 0 : i32
    %c0_i32_0 = arith.constant 0 : i32
    %c0_i32_1 = arith.constant 0 : i32
    return %c0_i32, %c0_i32_0 : i32, i32
  }
  func.func @transform_4(%arg0: i32) -> (i32, i32) {
    %c0_i32 = arith.constant 0 : i32
    %c0_i32_0 = arith.constant 0 : i32
    %c0_i32_1 = arith.constant 0 : i32
    return %c0_i32, %c0_i32_0 : i32, i32
  }
  func.func @transform_5(%arg0: i32) -> (i32, i32) {
    %c0_i32 = arith.constant 0 : i32
    %c0_i32_0 = arith.constant 0 : i32
    %c0_i32_1 = arith.constant 0 : i32
    return %c0_i32, %c0_i32_0 : i32, i32
  }
  func.func @transform_6(%arg0: i32) -> (i32, i32) {
    %c0_i32 = arith.constant 0 : i32
    %c0_i32_0 = arith.constant 0 : i32
    return %arg0, %c0_i32 : i32, i32
  }
}

</mosaic_0001>

<bundles_post_ra>
// kernel: tpu_custom_call.1
= control target key start
LH: loop header
LB: loop body
LE: loop exit
PB: predicated region body
PF: predicated region fallthrough
CT: control target
= control target key end

     0   :  { %11 = vsyncpa [#allocation3], 0  ;;  %s972_s0 = inlined_call_operand.vmem [shape: f32[2,16], index: 0, kind: input, shape index: {}]   ;;  %s973_s1 = inlined_call_operand.vmem [shape: f32[2,16], index: 1, kind: input, shape index: {}]   ;;  %s974_s2 = inlined_call_operand.vmem [shape: bf16[2,16,128], index: 2, kind: input, shape index: {}]   ;;  %s975_s3 = inlined_call_operand.vmem [shape: bf16[128,2], index: 3, kind: input, shape index: {}]   ;;  %s976_s4 = inlined_call_operand.hbm [shape: f32[256,128], index: 4, kind: input, shape index: {}]   ;;  %s977_s5 = inlined_call_operand.vmem [shape: f32[1,128], index: 5, kind: input, shape index: {}]   ;;  %s978_s6 = inlined_call_operand.hbm [shape: f32[2,128], index: 6, kind: output, shape index: {}]  }
   0x1   :  { %12 = vsyncpa [#allocation4], 0  ;;  %s25_s23 = sshll.u32 %s976_s4, 4  ;;  %s769_s24 = smov [#allocation2]   ;;  %s26_s23 = int_to_ptr.hbm [resolvable:$true] %s25_s23 }
   0x2   :  { %s27_s25 = sshll.u32 %s769_s24, 4  ;;  %s770_s26 = smov 128   ;;  %s28_s25 = int_to_ptr.vmem [resolvable:$true] %s27_s25 }
   0x3   :  { %s771_s27 = smov 8  }
   0x4   :  { %33 = dma.hbm_to_vmem [thread:$0]  %s26_s23, 4096, %s28_s25, [#allocation3], %s770_s26, %s770_s26, %s771_s27  }
   0x5   :  { %765 = dma.done.wait [#allocation3], 4096  }
   0x6   :  { %766 = vsyncadd [#allocation3], 4294963200  ;;  %v143_v0 = vlaneseq  ;;  %v648_v2 = vld [vmem:[%s975_s3 + $0x38] sm:$0xff]  ;;  %v647_v3 = vld [vmem:[%s975_s3 + $0x30] sm:$0xff]  ;;  %v772_v19 = vmov 1   ;;  %v773_v20 = vmov 0  }
   0x7   :  { %121 = vmatpush.bf16.msra.mxu0 %v648_v2  ;;  %v140_v4 = vld [vmem:[%s972_s0] sm:$0x3]  ;;  %v640_v7 = vld [vmem:[%s974_s2 + $0x8] sm:$0xff]  ;;  %v644_v12 = vld [vmem:[%s975_s3 + $0x18] sm:$0xff]  ;;  %vm197_vm0 = vcmask 130112   ;;  %vm202_vm1 = vcmask 1041409  }
   0x8   :  { %v144_v1 = vshrl.u32 %v143_v0, 7  ;;  %v155_v5 = vperm.slane %v140_v4, 1  ;;  %v142_v6 = vperm.slane %v140_v4, 0  ;;  %v639_v8 = vld [vmem:[%s974_s2] sm:$0xff]  ;;  %v646_v9 = vld [vmem:[%s975_s3 + $0x28] sm:$0xff]  ;;  %486 = vmatpush.bf16.msra.mxu2 %v640_v7  ;;  %v643_v14 = vld [vmem:[%s975_s3 + $0x10] sm:$0xff] }
   0x9   :  { %470 = vmatpush.bf16.msra.mxu1 %v639_v8  ;;  %v645_v11 = vld [vmem:[%s975_s3 + $0x20] sm:$0xff]  ;;  %v642_v16 = vld [vmem:[%s975_s3 + $0x8] sm:$0xff]  ;;  %v878_v43 = vand.u32 127, %v143_v0  ;;  %vm205_vm2 = vcmask 123904   ;;  %vm454_vm11 = vcmask 1040384   ;;  %vm459_vm12 = vcmask 130048  }
   0xa   :  { %658 = vset.pattern.permute.xlu1 %v144_v1  ;;  %656 = vset.pattern.permute.xlu0 %v144_v1  ;;  %v151_v10 = vadd.s32 8, %v144_v1  ;;  %v276_v13 = vld [vmem:[%s973_s1] sm:$0x3]  ;;  %vm493_vm13 = vcmask 1047556   ;;  %s775_s25 = smov [#allocation5]   ;;  %s585_s29 = sshll.u32 %s978_s6, 4  ;;  %s586_s29 = int_to_ptr.hbm [resolvable:$true] %s585_s29 }
   0xb   :  { %659 = vset.pattern.permute.xlu2 %v144_v1  ;;  %122 = vmatpush.bf16.msra.mxu0 %v647_v3  ;;  %v278_v15 = vperm.slane %v276_v13, 0  ;;  %v641_v17 = vld [vmem:[%s975_s3] sm:$0xff]  ;;  %v291_v18 = vperm.slane %v276_v13, 1  ;;  %v881_v46 = vadd.s32 4294967288, %v878_v43  ;;  %vm637_vm14 = vmneg %vm493_vm13  ;;  %s583_s26 = sshll.u32 %s775_s25, 4  ;;  %s584_s26 = int_to_ptr.vmem [resolvable:$true] %s583_s26 }
   0xf   :  { %123 = vmatpush.bf16.msra.mxu0 %v646_v9 }
  0x12   :  { %160 = vperm.xlu1 %658, %v155_v5   ;;  %147 = vperm.xlu0 %656, %v142_v6  }
  0x13   :  { %124 = vmatpush.bf16.msra.mxu0 %v645_v11  ;;  %283 = vperm.xlu2 %659, %v278_v15  }
  0x17   :  { %125 = vmatpush.bf16.msra.mxu0 %v644_v12 }
  0x1a   :  { %660 = vset.pattern.permute.xlu1 %v151_v10  ;;  %657 = vset.pattern.permute.xlu0 %v151_v10 }
  0x1b   :  { %126 = vmatpush.bf16.msra.mxu0 %v643_v14  ;;  %662 = vset.pattern.permute.xlu2 %v151_v10 }
  0x1f   :  { %127 = vmatpush.bf16.msra.mxu0 %v642_v16 }
  0x22   :  { %166 = vperm.xlu1 %660, %v155_v5   ;;  %153 = vperm.xlu0 %657, %v142_v6  }
  0x23   :  { %128 = vmatpush.bf16.msra.mxu0 %v641_v17  ;;  %289 = vperm.xlu2 %662, %v278_v15  }
  0x26   :  { %129 = vmatmul.bf16.vlgmr.msra.gmra.mxu0 %v639_v8 }
  0x2a   :  { %661 = vset.pattern.permute.xlu1 %v144_v1  ;;  %663 = vset.pattern.permute.xlu0 %v773_v20 }
  0x2b   :  { %302 = vperm.xlu2 %662, %v291_v18  }
  0x32   :  { %296 = vperm.xlu1 %661, %v291_v18  }
  0x33   :  { %664 = vset.pattern.permute.xlu2 %v772_v19 }
  0x36   :  { %134 = vmatmul.bf16.gmra.mxu0 %v640_v7 }
  0x3a   :  { %665 = vset.pattern.permute.xlu1 %v773_v20 }
  0x6d   :  { %v284_v21 = vpop.permute.xlu2 %283 }
  0x7d   :  { %v290_v26 = vpop.permute.xlu2 %289 }
  0x84   :  { %v148_v22 = vpop.permute.xlu0 %147  ;;  %v161_v31 = vpop.permute.xlu1 %160 }
  0x85   :  { %v303_v35 = vpop.permute.xlu2 %302 }
  0x94   :  { %v154_v27 = vpop.permute.xlu0 %153  ;;  %v167_v34 = vpop.permute.xlu1 %166 }
  0xa3   :  { %v130_v23 = vpop.f32.mrf.mxu0 }
  0xa4   :  { %v854_v24 = vadd.f32 %v148_v22, %v130_v23  ;;  %v856_v25 = vadd.f32 %v284_v21, %v130_v23  ;;  %v297_v39 = vpop.permute.xlu1 %296 }
  0xa6   :  { %317 = vperm.xlu2 %664, %v856_v25   ;;  %181 = vperm.xlu0 %663, %v854_v24  }
  0xab   :  { %v132_v28 = vpop.f32.mrf.mxu0 }
  0xac   :  { %v173_v29 = vadd.f32 %v154_v27, %v132_v28  ;;  %v860_v30 = vadd.f32 %v290_v26, %v132_v28 }
  0xae   :  { %666 = vset.pattern.permute.xlu0 %v772_v19  ;;  %184 = vperm.xlu1 %665, %v173_v29  }
  0xaf   :  { %320 = vperm.xlu0 %666, %v860_v30   ;;  %667 = vset.pattern.permute.xlu2 %v773_v20 }
  0xb3   :  { %v135_v32 = vpop.f32.mrf.mxu0 }
  0xb4   :  { %v174_v33 = vadd.f32 %v161_v31, %v135_v32  ;;  %v873_v40 = vadd.f32 %v297_v39, %v135_v32 }
  0xb6   :  { %187 = vperm.xlu2 %667, %v174_v33  }
  0xb7   :  { %670 = vset.pattern.permute.xlu0 %v773_v20 }
  0xbb   :  { %v137_v36 = vpop.f32.mrf.mxu0 }
  0xbc   :  { %v866_v37 = vadd.f32 %v167_v34, %v137_v36  ;;  %v868_v38 = vadd.f32 %v303_v35, %v137_v36 }
  0xbe   :  { %669 = vset.pattern.permute.xlu2 %v772_v19  ;;  %190 = vperm.xlu1 %665, %v866_v37  }
  0xbf   :  { %326 = vperm.xlu2 %669, %v868_v38  }
  0xc6   :  { %668 = vset.pattern.permute.xlu1 %v772_v19 }
  0xc7   :  { %323 = vperm.xlu1 %668, %v873_v40  }
 0x100   :  { %v318_v41 = vpop.permute.xlu2 %317 }
 0x101   :  { %v328_v60 = vperm.slane %v318_v41, %v878_v43 }
 0x110   :  { %v188_v45 = vpop.permute.xlu2 %187 }
 0x111   :  { %v199_v49 = vperm.slane %v188_v45, %v878_v43 }
 0x118   :  { %v182_v44 = vpop.permute.xlu0 %181 }
 0x119   :  { %v194_v50 = vperm.slane %v182_v44, %v878_v43  ;;  %v327_v57 = vpop.permute.xlu2 %326 }
 0x11a   :  { %v332_v61 = vperm.slane %v327_v57, %v881_v46 }
 0x120   :  { %v185_v42 = vpop.permute.xlu1 %184 }
 0x121   :  { %v196_v47 = vperm.slane %v185_v42, %v881_v46  ;;  %v321_v55 = vpop.permute.xlu0 %320 }
 0x122   :  { %v329_v58 = vperm.slane %v321_v55, %v881_v46 }
 0x123   :  { %v198_v52 = vsel %vm197_vm0, %v196_v47, %v194_v50 }
 0x124   :  { %v330_v63 = vsel %vm197_vm0, %v329_v58, %v328_v60 }
 0x130   :  { %v191_v48 = vpop.permute.xlu1 %190 }
 0x131   :  { %v200_v51 = vperm.slane %v191_v48, %v881_v46 }
 0x133   :  { %v201_v53 = vsel %vm197_vm0, %v200_v51, %v199_v49 }
 0x134   :  { %v203_v54 = vsel %vm202_vm1, %v201_v53, %v198_v52 }
 0x135   :  { %v206_v56 = vsel %vm205_vm2, %v203_v54, -inf }
 0x136   :  { %207 = vmax.xlane.f32.xlu1 %v206_v56 }
 0x139   :  { %v324_v59 = vpop.permute.xlu1 %323 }
 0x13a   :  { %v331_v62 = vperm.slane %v324_v59, %v878_v43 }
 0x13c   :  { %v333_v0 = vsel %vm197_vm0, %v332_v61, %v331_v62 }
 0x13d   :  { %v334_v1 = vsel %vm202_vm1, %v333_v0, %v330_v63 }
 0x13e   :  { %v336_v2 = vsel %vm205_vm2, %v334_v1, -inf }
 0x13f   :  { %337 = vmax.xlane.f32.xlu2 %v336_v2 }
 0x1a9   :  { %v208_v3 = vpop.xlane.xlu1 %207 }
 0x1aa   :  { %v210_v4 = vperm.slane %v208_v3, 0  ;;  %v211_v10 = vperm.slane %v208_v3, 1 }
 0x1ac   :  { %v214_v5 = vsub.f32 %v854_v24, %v210_v4  ;;  %v215_v7 = vsub.f32 %v173_v29, %v210_v4  ;;  %v216_v17 = vsub.f32 %v174_v33, %v211_v10  ;;  %v217_v24 = vsub.f32 %v866_v37, %v211_v10 }
 0x1ae   :  { %v218_v6 = vmul.f32 1.442695, %v214_v5  ;;  %v220_v11 = vmul.f32 1.442695, %v215_v7  ;;  %v222_v18 = vmul.f32 1.442695, %v216_v17 }
 0x1b0   :  { %697 = vpow2.f32 %v218_v6 }
 0x1b1   :  { %699 = vpow2.f32 %v220_v11 }
 0x1b2   :  { %v338_v8 = vpop.xlane.xlu2 %337 }
 0x1b3   :  { %v340_v9 = vperm.slane %v338_v8, 0  ;;  %v341_v26 = vperm.slane %v338_v8, 1 }
 0x1b5   :  { %v344_v12 = vsub.f32 %v856_v25, %v340_v9  ;;  %v345_v13 = vsub.f32 %v860_v30, %v340_v9  ;;  %v224_v25 = vmul.f32 1.442695, %v217_v24  ;;  %v346_v28 = vsub.f32 %v873_v40, %v341_v26 }
 0x1b6   :  { %v902_v14 = vpop.eup %697  ;;  %v347_v31 = vsub.f32 %v868_v38, %v341_v26 }
 0x1b7   :  { %v348_v15 = vmul.f32 1.442695, %v344_v12  ;;  %v350_v16 = vmul.f32 1.442695, %v345_v13  ;;  %231 = vperm.xlu0 %670, %v902_v14   ;;  %v905_v21 = vpop.eup %699  ;;  %v352_v29 = vmul.f32 1.442695, %v346_v28 }
 0x1b8   :  { %v354_v32 = vmul.f32 1.442695, %v347_v31 }
 0x1b9   :  { %701 = vpow2.f32 %v348_v15 }
 0x1ba   :  { %703 = vpow2.f32 %v350_v16 }
 0x1bb   :  { %705 = vpow2.f32 %v222_v18 }
 0x1bc   :  { %707 = vpow2.f32 %v224_v25 }
 0x1bd   :  { %709 = vpow2.f32 %v352_v29 }
 0x1be   :  { %711 = vpow2.f32 %v354_v32 }
 0x1bf   :  { %v907_v22 = vpop.eup %701  ;;  %234 = vperm.xlu0 %670, %v905_v21  }
 0x1c0   :  { %v910_v23 = vpop.eup %703  ;;  %361 = vperm.xlu2 %669, %v907_v22  }
 0x1c1   :  { %364 = vperm.xlu1 %668, %v910_v23   ;;  %v706_v27 = vpop.eup %705 }
 0x1c2   :  { %v708_v30 = vpop.eup %707 }
 0x1c3   :  { %v917_v33 = vpop.eup %709 }
 0x1c4   :  { %v921_v34 = vpop.eup %711 }
 0x1c7   :  { %237 = vperm.xlu0 %670, %v706_v27  }
 0x1cf   :  { %240 = vperm.xlu0 %670, %v708_v30  }
 0x1d7   :  { %671 = vset.pattern.permute.xlu0 %v772_v19 }
 0x1d8   :  { %367 = vperm.xlu0 %671, %v917_v33  }
 0x1e0   :  { %370 = vperm.xlu0 %671, %v921_v34  }
 0x1e8   :  { %672 = vset.pattern.permute.xlu0 %v773_v20 }
 0x21a   :  { %v362_v51 = vpop.permute.xlu2 %361 }
 0x21b   :  { %v372_v54 = vperm.slane %v362_v51, %v878_v43  ;;  %v526_v51 = vld [vmem:[#allocation2 + $0xc8] sm:$0xff] }
 0x229   :  { %v232_v35 = vpop.permute.xlu0 %231 }
 0x22a   :  { %v242_v40 = vperm.slane %v232_v35, %v878_v43 }
 0x231   :  { %v235_v36 = vpop.permute.xlu0 %234 }
 0x232   :  { %v243_v38 = vperm.slane %v235_v36, %v881_v46 }
 0x233   :  { %v365_v50 = vpop.permute.xlu1 %364 }
 0x234   :  { %v244_v44 = vsel %vm197_vm0, %v243_v38, %v242_v40  ;;  %v373_v52 = vperm.slane %v365_v50, %v881_v46  ;;  %v510_v50 = vld [vmem:[#allocation2 + $0x48] sm:$0xff] }
 0x236   :  { %v374_v57 = vsel %vm197_vm0, %v373_v52, %v372_v54  ;;  %v509_v54 = vld [vmem:[#allocation2 + $0x40] sm:$0xff] }
 0x239   :  { %v238_v37 = vpop.permute.xlu0 %237 }
 0x23a   :  { %v245_v41 = vperm.slane %v238_v37, %v878_v43 }
 0x241   :  { %v241_v39 = vpop.permute.xlu0 %240 }
 0x242   :  { %v246_v42 = vperm.slane %v241_v39, %v881_v46 }
 0x244   :  { %v247_v45 = vsel %vm197_vm0, %v246_v42, %v245_v41 }
 0x245   :  { %v248_v47 = vsel %vm202_vm1, %v247_v45, %v244_v44  ;;  %v514_v44 = vld [vmem:[#allocation2 + $0x68] sm:$0xff] }
 0x246   :  { %v250_v48 = vsel %vm205_vm2, %v248_v47, 0.0  ;;  %v530_v45 = vld [vmem:[#allocation2 + $0xe8] sm:$0xff]  ;;  %v513_v47 = vld [vmem:[#allocation2 + $0x60] sm:$0xff] }
 0x247   :  { %251 = vadd.xlane.f32.xlu2 %v250_v48  ;;  %v512_v48 = vld [vmem:[#allocation2 + $0x58] sm:$0xff] }
 0x24a   :  { %v368_v49 = vpop.permute.xlu0 %367 }
 0x24b   :  { %v375_v55 = vperm.slane %v368_v49, %v878_v43  ;;  %v527_v49 = vld [vmem:[#allocation2 + $0xd0] sm:$0xff] }
 0x252   :  { %v371_v53 = vpop.permute.xlu0 %370 }
 0x253   :  { %v376_v56 = vperm.slane %v371_v53, %v881_v46 }
 0x255   :  { %v377_v58 = vsel %vm197_vm0, %v376_v56, %v375_v55  ;;  %v525_v55 = vld [vmem:[#allocation2 + $0xc0] sm:$0xff] }
 0x256   :  { %v378_v59 = vsel %vm202_vm1, %v377_v58, %v374_v57  ;;  %v508_v57 = vld [vmem:[#allocation2 + $0x38] sm:$0xff] }
 0x257   :  { %v380_v60 = vsel %vm205_vm2, %v378_v59, 0.0  ;;  %v524_v58 = vld [vmem:[#allocation2 + $0xb8] sm:$0xff] }
 0x258   :  { %381 = vadd.xlane.f32.xlu1 %v380_v60 }
 0x2ba   :  { %v252_v61 = vpop.xlane.xlu2 %251 }
 0x2bb   :  { %713 = vrcp.f32 %v252_v61  ;;  %v264_v1 = vand.u32 2147483648, %v252_v61  ;;  %v262_v3 = vand.u32 2147483647, %v252_v61  ;;  %vm258_vm4 = vweird.f32 %v252_v61 }
 0x2bd   :  { %v265_v5 = vor.u32 1.1754944e-38, %v264_v1  ;;  %vm263_vm6 = vcmp.eq.f32.partialorder %v262_v3, 8.507059e+37 }
 0x2c1   :  { %v714_v62 = vpop.eup %713 }
 0x2c2   :  { %v254_v63 = vmul.f32 %v714_v62, %v252_v61  ;;  %vm259_vm3 = vweird.f32 %v714_v62 }
 0x2c3   :  { %vm260_vm5 = vmor %vm258_vm4, %vm259_vm3 }
 0x2c4   :  { %v255_v0 = vsub.f32 1.0, %v254_v63  ;;  %v507_v63 = vld [vmem:[#allocation2 + $0x30] sm:$0xff] }
 0x2c6   :  { %v256_v2 = vmul.f32 %v714_v62, %v255_v0  ;;  %v523_v0 = vld [vmem:[#allocation2 + $0xb0] sm:$0xff] }
 0x2c8   :  { %v257_v4 = vadd.f32 %v714_v62, %v256_v2 }
 0x2ca   :  { %v261_v6 = vsel %vm260_vm5, %v714_v62, %v257_v4  ;;  %v506_v4 = vld [vmem:[#allocation2 + $0x28] sm:$0xff] }
 0x2cb   :  { %v382_v7 = vpop.xlane.xlu1 %381  ;;  %v266_v8 = vsel %vm263_vm6, %v265_v5, %v261_v6  ;;  %v522_v5 = vld [vmem:[#allocation2 + $0xa8] sm:$0xff] }
 0x2cc   :  { %715 = vrcp.f32 %v382_v7  ;;  %v269_v9 = vperm.slane %v266_v8, 1  ;;  %v394_v17 = vand.u32 2147483648, %v382_v7  ;;  %v392_v24 = vand.u32 2147483647, %v382_v7 }
 0x2cd   :  { %vm388_vm8 = vweird.f32 %v382_v7  ;;  %v268_v39 = vperm.slane %v266_v8, 0 }
 0x2ce   :  { %v274_v10 = vmul.f32 %v706_v27, %v269_v9  ;;  %v275_v11 = vmul.f32 %v708_v30, %v269_v9  ;;  %v395_v26 = vor.u32 1.1754944e-38, %v394_v17  ;;  %vm393_vm10 = vcmp.eq.f32.partialorder %v392_v24, 8.507059e+37 }
 0x2cf   :  { %v272_v40 = vmul.f32 %v902_v14, %v268_v39  ;;  %v273_v41 = vmul.f32 %v905_v21, %v268_v39  ;;  %v529_v14 = vld [vmem:[#allocation2 + $0xe0] sm:$0xff]  ;;  %v774_v39 = vmov 1934713408  }
 0x2d0   :  { %v673_v12 = vpack.i.bf16 %v275_v11, %v274_v10  ;;  %v505_v11 = vld [vmem:[#allocation2 + $0x20] sm:$0xff] }
 0x2d1   :  { %v685_v42 = vpack.i.bf16 %v273_v41, %v272_v40  ;;  %v496_v40 = vunpack.c.l.s4 %v774_v39 }
 0x2d2   :  { %v716_v13 = vpop.eup %715  ;;  %674 = vperm.xlu0 %672, %v673_v12  }
 0x2d3   :  { %v384_v15 = vmul.f32 %v716_v13, %v382_v7  ;;  %vm389_vm7 = vweird.f32 %v716_v13 }
 0x2d4   :  { %vm390_vm9 = vmor %vm388_vm8, %vm389_vm7 }
 0x2d5   :  { %v385_v16 = vsub.f32 1.0, %v384_v15 }
 0x2d7   :  { %v386_v18 = vmul.f32 %v716_v13, %v385_v16 }
 0x2d9   :  { %v387_v25 = vadd.f32 %v716_v13, %v386_v18 }
 0x2da   :  { %678 = vset.pattern.permute.xlu0 %v772_v19 }
 0x2db   :  { %v391_v28 = vsel %vm390_vm9, %v716_v13, %v387_v25 }
 0x2dc   :  { %v396_v29 = vsel %vm393_vm10, %v395_v26, %v391_v28 }
 0x2dd   :  { %v399_v27 = vperm.slane %v396_v29, 1  ;;  %v398_v30 = vperm.slane %v396_v29, 0 }
 0x2df   :  { %v404_v31 = vmul.f32 %v917_v33, %v399_v27  ;;  %v405_v32 = vmul.f32 %v921_v34, %v399_v27  ;;  %v402_v35 = vmul.f32 %v907_v22, %v398_v30  ;;  %v403_v36 = vmul.f32 %v910_v23, %v398_v30  ;;  %v516_v33 = vld [vmem:[#allocation2 + $0x78] sm:$0xff]  ;;  %v515_v34 = vld [vmem:[#allocation2 + $0x70] sm:$0xff] }
 0x2e0   :  { %v532_v22 = vld [vmem:[#allocation2 + $0xf8] sm:$0xff]  ;;  %537 = vmatpush.msra.mxu3 %v516_v33  ;;  %v531_v23 = vld [vmem:[#allocation2 + $0xf0] sm:$0xff]  ;;  %v497_v33 = vunpack.c.0.s8 %v496_v40 }
 0x2e1   :  { %v679_v37 = vpack.i.bf16 %v405_v32, %v404_v31  ;;  %v690_v38 = vpack.i.bf16 %v403_v36, %v402_v35  ;;  %557 = vmatpush.msrb.mxu1 %v532_v22  ;;  %v504_v30 = vld [vmem:[#allocation2 + $0x18] sm:$0xff]  ;;  %v521_v31 = vld [vmem:[#allocation2 + $0xa0] sm:$0xff]  ;;  %v503_v32 = vld [vmem:[#allocation2 + $0x10] sm:$0xff] }
 0x2e2   :  { %538 = vmatpush.msra.mxu3 %v515_v34  ;;  %v520_v35 = vld [vmem:[#allocation2 + $0x98] sm:$0xff]  ;;  %v519_v36 = vld [vmem:[#allocation2 + $0x90] sm:$0xff] }
 0x2e3   :  { %680 = vperm.xlu0 %678, %v679_v37   ;;  %691 = vperm.xlu2 %669, %v690_v38   ;;  %v518_v37 = vld [vmem:[#allocation2 + $0x88] sm:$0xff]  ;;  %v517_v38 = vld [vmem:[#allocation2 + $0x80] sm:$0xff] }
 0x2e4   :  { %558 = vmatpush.msrb.mxu1 %v531_v23  ;;  %539 = vmatpush.msra.mxu3 %v514_v44 }
 0x2e6   :  { %559 = vmatpush.msrb.mxu1 %v530_v45  ;;  %540 = vmatpush.msra.mxu3 %v513_v47 }
 0x2e8   :  { %560 = vmatpush.msrb.mxu1 %v529_v14  ;;  %541 = vmatpush.msra.mxu3 %v512_v48  ;;  %v696_v14 = vld [vmem:[%s977_s5] ss:$0 sm:$0xff] }
 0x2eb   :  { %684 = vset.pattern.permute.xlu0 %v773_v20  ;;  %v528_v20 = vld [vmem:[#allocation2 + $0xd8] sm:$0xff] }
 0x2ec   :  { %686 = vperm.xlu0 %684, %v685_v42   ;;  %561 = vmatpush.msrb.mxu1 %v528_v20 }
 0x2ee   :  { %562 = vmatpush.msrb.mxu1 %v527_v49 }
 0x2f0   :  { %563 = vmatpush.msrb.mxu1 %v526_v51 }
 0x2f2   :  { %564 = vmatpush.msrb.mxu1 %v525_v55 }
 0x2f4   :  { %695 = vset.pattern.permute.xlu0 %v772_v19  ;;  %v511_v19 = vld [vmem:[#allocation2 + $0x50] sm:$0xff]  ;;  %565 = vmatpush.msrb.mxu1 %v524_v58 }
 0x2f5   :  { %542 = vmatpush.msra.mxu3 %v511_v19 }
 0x2f6   :  { %566 = vmatpush.msrb.mxu1 %v523_v0 }
 0x2f7   :  { %543 = vmatpush.msra.mxu3 %v510_v50 }
 0x2f8   :  { %567 = vmatpush.msrb.mxu1 %v522_v5 }
 0x2f9   :  { %544 = vmatpush.msra.mxu3 %v509_v54 }
 0x2fa   :  { %568 = vmatpush.msrb.mxu1 %v521_v31 }
 0x2fb   :  { %545 = vmatpush.msra.mxu3 %v508_v57 }
 0x2fc   :  { %569 = vmatpush.msrb.mxu1 %v520_v35 }
 0x2fd   :  { %546 = vmatpush.msra.mxu3 %v507_v63 }
 0x2fe   :  { %570 = vmatpush.msrb.mxu1 %v519_v36 }
 0x2ff   :  { %547 = vmatpush.msra.mxu3 %v506_v4 }
 0x300   :  { %571 = vmatpush.msrb.mxu1 %v518_v37 }
 0x301   :  { %548 = vmatpush.msra.mxu3 %v505_v11 }
 0x302   :  { %572 = vmatpush.msrb.mxu1 %v517_v38 }
 0x303   :  { %549 = vmatpush.msra.mxu3 %v504_v30 }
 0x305   :  { %550 = vmatpush.msra.mxu3 %v503_v32 }
 0x33d   :  { %v692_v1 = vpop.permute.xlu2 %691 }
 0x33e   :  { %v694_v8 = vunpack.i.h.bf16 %v692_v1  ;;  %v693_v9 = vunpack.i.l.bf16 %v692_v1 }
 0x340   :  { %v447_v15 = vperm.slane %v694_v8, %v881_v46  ;;  %v446_v16 = vperm.slane %v693_v9, %v878_v43 }
 0x342   :  { %v448_v28 = vsel %vm197_vm0, %v447_v15, %v446_v16 }
 0x344   :  { %v675_v21 = vpop.permute.xlu0 %674 }
 0x345   :  { %v677_v52 = vunpack.i.h.bf16 %v675_v21  ;;  %v676_v53 = vunpack.i.l.bf16 %v675_v21 }
 0x347   :  { %v426_v59 = vperm.slane %v677_v52, %v881_v46  ;;  %v425_v60 = vperm.slane %v676_v53, %v878_v43 }
 0x349   :  { %v427_v6 = vsel %vm197_vm0, %v426_v59, %v425_v60 }
 0x355   :  { %v681_v56 = vpop.permute.xlu0 %680 }
 0x356   :  { %v683_v61 = vunpack.i.h.bf16 %v681_v56  ;;  %v682_v62 = vunpack.i.l.bf16 %v681_v56 }
 0x358   :  { %v450_v2 = vperm.slane %v683_v61, %v881_v46  ;;  %v449_v3 = vperm.slane %v682_v62, %v878_v43 }
 0x35a   :  { %v451_v7 = vsel %vm197_vm0, %v450_v2, %v449_v3 }
 0x35b   :  { %v456_v10 = vsel %vm454_vm11, %v427_v6, %v451_v7 }
 0x35c   :  { %v458_v12 = vpack.c.bf16 %v456_v10, %v456_v10 }
 0x35e   :  { %v687_v13 = vpop.permute.xlu0 %686  ;;  %636 = vmatmul.msk.bf16.vlgmr.msra.gmra.mxu2 %vm459_vm12, %v458_v12 }
 0x35f   :  { %v689_v17 = vunpack.i.h.bf16 %v687_v13  ;;  %v688_v18 = vunpack.i.l.bf16 %v687_v13 }
 0x361   :  { %v423_v24 = vperm.slane %v689_v17, %v881_v46  ;;  %v422_v25 = vperm.slane %v688_v18, %v878_v43  ;;  %v502_v46 = vld [vmem:[#allocation2 + $0x8] sm:$0xff]  ;;  %v501_v43 = vld [vmem:[#allocation2] sm:$0xff] }
 0x362   :  { %551 = vmatpush.msra.mxu3 %v502_v46 }
 0x363   :  { %v424_v26 = vsel %vm197_vm0, %v423_v24, %v422_v25 }
 0x364   :  { %v455_v29 = vsel %vm454_vm11, %v424_v26, %v448_v28  ;;  %552 = vmatpush.msra.mxu3 %v501_v43 }
 0x365   :  { %v457_v27 = vpack.c.bf16 %v455_v29, %v455_v29 }
 0x367   :  { %635 = vmatmul.msk.bf16.vlgmr.msra.gmra.mxu1 %vm459_vm12, %v457_v27 }
 0x3e1   :  { %v488_v41 = vpop.f32.mrf.mxu2 }
 0x3e2   :  { %v492_v42 = vrot.slane %v488_v41, 4 }
 0x3e4   :  { %v472_v34 = vpop.f32.mrf.mxu1 }
 0x3e5   :  { %v494_v22 = vsel %vm493_vm13, %v492_v42, %v472_v34 }
 0x3e6   :  { %v498_v23 = vperm.slane %v494_v22, %v497_v33 }
 0x3e8   :  { %v499_v44 = vrot.slane %v498_v23, 4  ;;  %553 = vmatmul.f32.vlgmr.msra.gmra.mxu3 %v498_v23 }
 0x3e9   :  { %v490_v45 = vpop.f32.mrf.mxu2 }
 0x3ea   :  { %638 = vmatmul.msk.f32.vlgmr.msrb.gmra.mxu1 %vm637_vm14, %v499_v44 }
 0x3ec   :  { %v474_v47 = vpop.f32.mrf.mxu1 }
 0x467   :  { %v574_v20 = vpop.f32.mrf.mxu1 }
 0x46b   :  { %v554_v21 = vpop.f32.mrf.mxu3 }
 0x46c   :  { %v555_v48 = vadd.f32 %v696_v14, %v554_v21 }
 0x46e   :  { %v575_v19 = vadd.f32 %v574_v20, %v555_v48 }
 0x470   :  { %577 = vst [vmem:[#allocation5] sm:$0x3] %v575_v19 }
 0x471   :  { %588 = dma.vmem_to_hbm [thread:$0]  %s584_s26, 32, %s586_s29, [#allocation4]  }
 0x472   :  { %767 = dma.done.wait [#allocation4], 32  }
 0x473   :  { %768 = vsyncadd [#allocation4], 4294967264 }
 0x474   :  { %593 = vsyncpa [#allocation3], 1 }
 0x475   :  { %594 = vsyncpa [#allocation4], 1 }

</bundles_post_ra>
